<compile_context>
chip_gen: v7x
topology: tpu7x:2x2x1
jax: 0.10.0
libtpu: 0.0.40
codegen_flags: <defaults>
</compile_context>

<pallas_src>
import jax
import jax.numpy as jnp
import numpy as np
from jax.experimental import pallas as pl
from jax.experimental.pallas import tpu as pltpu


def _conv_share_kernel(x_ref, halo_ref, w_ref, pw_ref, pb_ref, out_ref,
                       win_ref, acc_ref):
    # x_ref   : (1, TL, D)        current sequence tile (input dtype)
    # halo_ref: (1, 1, Hh, D)     next Wmax-1 rows (zeros past the sequence end)
    # w_ref   : (W, D, D)         w_ref[k, c_in, c_out] = conv_weight[c_out, c_in, k]
    # pw_ref  : (D, D)            projection weight transposed to (in, out), compute dtype
    # pb_ref  : (1, D)            projection bias, float32
    # out_ref : (1, TL, W, D)
    # win_ref : (TL + Hh, D)      VMEM scratch: tile + right halo, compute dtype
    # acc_ref : (TL, D) float32   VMEM scratch: running conv accumulator
    Wmax = w_ref.shape[0]
    TL = x_ref.shape[1]
    cdt = win_ref.dtype

    # Stage tile + halo contiguously so every tap slices a shifted (TL, D)
    # window straight from the VMEM ref (streaming loads, no big live value).
    win_ref[:TL, :] = x_ref[0].astype(cdt)
    if Wmax > 1:
        win_ref[TL:TL + Wmax - 1, :] = halo_ref[0, 0].astype(cdt)

    pw = pw_ref[...]
    pb = pb_ref[...]

    acc_ref[...] = jnp.zeros_like(acc_ref)
    # Static unroll over taps: the width-k span rep is the running sum of the
    # shifted (TL, D) @ (D, D) MXU contractions (== conv1d with weight[:, :, :k+1]).
    # Each width's projection is written out as soon as it is ready (streamed
    # per-k stores instead of stacking W live copies).
    for k in range(Wmax):
        x_shift = win_ref[k:k + TL, :]                       # (TL, D), compute dtype
        acc_ref[...] += jnp.dot(x_shift, w_ref[k],
                                preferred_element_type=jnp.float32)
        h = jnp.maximum(acc_ref[...], 0.0).astype(cdt)
        proj = jnp.dot(h, pw, preferred_element_type=jnp.float32) + pb
        out_ref[0, :, k, :] = proj.astype(out_ref.dtype)


def conv_share_forward(x, conv_weight, proj_w, proj_b, *,
                       seq_tile=256, compute_dtype=jnp.bfloat16):
    """x: (B, L, D); conv_weight: (D, D, W) (PyTorch conv1d layout);
    proj_w: (D, D) (out, in); proj_b: (D,).  Returns (B, L, W, D) in x.dtype."""
    B, L, D = x.shape
    Wmax = conv_weight.shape[-1]

    # Sequence tile: multiple of 8 sublanes, no larger than the rounded-up length.
    TL = max(8, min(int(seq_tile), pl.cdiv(L, 8) * 8))
    T = pl.cdiv(L, TL)
    Lp = T * TL
    Hh = max(Wmax - 1, 1)

    xp = x if Lp == L else jnp.pad(x, ((0, 0), (0, Lp - L), (0, 0)))

    # Right halo per tile: rows [(t+1)*TL, (t+1)*TL + Hh) of the zero-extended
    # sequence.  Tiny (B, T, Hh, D) side input; avoids overlapping-block DMAs.
    x_ext = jnp.pad(x, ((0, 0), (0, Lp + Hh - L), (0, 0)))
    rows = (jnp.arange(T)[:, None] + 1) * TL + jnp.arange(Hh)[None, :]
    halo = x_ext[:, rows, :]                                   # (B, T, Hh, D)

    # Pre-arrange weights; casting to the compute dtype in the wrapper halves
    # the VMEM footprint of these grid-invariant (double-buffered) operands.
    w_mat = jnp.transpose(conv_weight, (2, 1, 0)).astype(compute_dtype)  # (W, Din, Dout)
    pw = proj_w.T.astype(compute_dtype)                                  # (Din, Dout)
    pb = proj_b.reshape(1, D).astype(jnp.float32)

    out = pl.pallas_call(
        _conv_share_kernel,
        out_shape=jax.ShapeDtypeStruct((B, Lp, Wmax, D), x.dtype),
        grid_spec=pltpu.PrefetchScalarGridSpec(
            num_scalar_prefetch=0,
            grid=(B, T),
            in_specs=[
                pl.BlockSpec((1, TL, D), lambda b, t: (b, t, 0)),
                pl.BlockSpec((1, 1, Hh, D), lambda b, t: (b, t, 0, 0)),
                # Grid-invariant operands (constant index_map => fetched once).
                pl.BlockSpec((Wmax, D, D), lambda b, t: (0, 0, 0)),
                pl.BlockSpec((D, D), lambda b, t: (0, 0)),
                pl.BlockSpec((1, D), lambda b, t: (0, 0)),
            ],
            out_specs=pl.BlockSpec((1, TL, Wmax, D), lambda b, t: (b, t, 0, 0)),
            scratch_shapes=[
                pltpu.VMEM((TL + Hh, D), compute_dtype),   # tile + halo window
                pltpu.VMEM((TL, D), jnp.float32),          # conv accumulator
            ],
        ),
        compiler_params=pltpu.CompilerParams(
            dimension_semantics=("parallel", "parallel"),
            vmem_limit_bytes=64 * 1024 * 1024,
        ),
    )(xp, halo, w_mat, pw, pb)

    return out if Lp == L else out[:, :L]


def conv_share_ref(x, conv_weight, proj_w, proj_b):
    """Pure-JAX reference mirroring the PyTorch forward."""
    B, L, D = x.shape
    Wmax = conv_weight.shape[-1]
    spans = []
    for i in range(Wmax):
        x_pad = jnp.pad(x, ((0, 0), (0, i), (0, 0)))
        acc = jnp.zeros((B, L, D), jnp.float32)
        for k in range(i + 1):
            acc = acc + jnp.einsum('blc,oc->blo',
                                   x_pad[:, k:k + L, :], conv_weight[:, :, k])
        spans.append(acc)
    span = jnp.stack(spans, axis=2)                            # (B, L, W, D)
    return jnp.maximum(span, 0.0) @ proj_w.T + proj_b


if __name__ == "__main__":
    key = jax.random.PRNGKey(0)
    k_x, k_cw, k_pw, k_pb, k_x2 = jax.random.split(key, 5)

    B, L, D, Wmax = 2, 8, 32, 4
    x = jax.random.normal(k_x, (B, L, D), jnp.float32)

    # conv_weight: (hidden, hidden, max_width), kaiming-uniform-ish (relu gain)
    fan_in = D * Wmax
    bound = np.sqrt(2.0) * np.sqrt(3.0 / fan_in)
    conv_weight = jax.random.uniform(k_cw, (D, D, Wmax), jnp.float32,
                                     minval=-bound, maxval=bound)

    # nn.Linear(hidden, hidden) params (deterministic synthetic init)
    lin_bound = 1.0 / np.sqrt(D)
    proj_w = jax.random.uniform(k_pw, (D, D), jnp.float32,
                                minval=-lin_bound, maxval=lin_bound)
    proj_b = jax.random.uniform(k_pb, (D,), jnp.float32,
                                minval=-lin_bound, maxval=lin_bound)

    ref = conv_share_ref(x, conv_weight, proj_w, proj_b)

    # Full-precision path: tight check of the tiling / halo / projection logic.
    out_f32 = jax.block_until_ready(
        conv_share_forward(x, conv_weight, proj_w, proj_b,
                           compute_dtype=jnp.float32))
    np.testing.assert_allclose(np.asarray(out_f32), np.asarray(ref),
                               rtol=1e-2, atol=1e-2)
    assert out_f32.shape == (B, L, Wmax, D)

    # Default fast path: bf16 MXU operands with f32 accumulation.
    out_bf16 = jax.block_until_ready(
        conv_share_forward(x, conv_weight, proj_w, proj_b))
    np.testing.assert_allclose(np.asarray(out_bf16), np.asarray(ref),
                               rtol=4e-2, atol=4e-2)
    assert out_bf16.shape == (B, L, Wmax, D)

    # Multi-tile + halo-crossing + ragged-length exercise of the L tiling.
    L2 = 20
    x2 = jax.random.normal(k_x2, (B, L2, D), jnp.float32)
    ref2 = conv_share_ref(x2, conv_weight, proj_w, proj_b)
    out2 = jax.block_until_ready(
        conv_share_forward(x2, conv_weight, proj_w, proj_b,
                           seq_tile=8, compute_dtype=jnp.float32))
    np.testing.assert_allclose(np.asarray(out2), np.asarray(ref2),
                               rtol=1e-2, atol=1e-2)
    assert out2.shape == (B, L2, Wmax, D)

    print("KERNEL_OK")
</pallas_src>

<mosaic_0001>
module attributes {stable_mosaic.version = 11 : i64} {
  func.func @_conv_share_kernel(%arg0: i32, %arg1: i32, %arg2: memref<1x8x32xf32, #tpu.memory_space<vmem>>, %arg3: memref<1x1x3x32xf32, #tpu.memory_space<vmem>>, %arg4: memref<4x32x32xf32, #tpu.memory_space<vmem>>, %arg5: memref<32x32xf32, #tpu.memory_space<vmem>>, %arg6: memref<1x32xf32, #tpu.memory_space<vmem>>, %arg7: memref<1x8x4x32xf32, #tpu.memory_space<vmem>>, %arg8: memref<11x32xf32, #tpu.memory_space<vmem>>, %arg9: memref<8x32xf32, #tpu.memory_space<vmem>>) attributes {dimension_semantics = [#tpu.dimension_semantics<parallel>, #tpu.dimension_semantics<parallel>], iteration_bounds = array<i64: 2, 1>, scalar_prefetch = 0 : i64, scratch_operands = 2 : i64, tpu.core_type = #tpu.core_type<tc>, window_params = [{transform_indices = @transform_0, window_bounds = array<i64: 1, 8, 32>}, {transform_indices = @transform_1, window_bounds = array<i64: 1, 1, 3, 32>}, {pipeline_mode = #tpu.pipeline_mode<synchronous>, transform_indices = @transform_2, window_bounds = array<i64: 4, 32, 32>}, {pipeline_mode = #tpu.pipeline_mode<synchronous>, transform_indices = @transform_3, window_bounds = array<i64: 32, 32>}, {pipeline_mode = #tpu.pipeline_mode<synchronous>, transform_indices = @transform_4, window_bounds = array<i64: 1, 32>}, {transform_indices = @transform_5, window_bounds = array<i64: 1, 8, 4, 32>}]} {
    %c0 = arith.constant 0 : index
    %c0_0 = arith.constant 0 : index
    %c0_1 = arith.constant 0 : index
    %0 = vector.load %arg2[%c0, %c0_0, %c0_1] : memref<1x8x32xf32, #tpu.memory_space<vmem>>, vector<1x8x32xf32>
    %1 = vector.shape_cast %0 : vector<1x8x32xf32> to vector<8x32xf32>
    %c0_2 = arith.constant 0 : index
    %c0_3 = arith.constant 0 : index
    %2 = vector.load %arg8[%c0_2, %c0_3] : memref<11x32xf32, #tpu.memory_space<vmem>>, vector<8x32xf32>
    tpu.vector_store %arg8[%c0_2, %c0_3], %1 {strides = array<i32>} : memref<11x32xf32, #tpu.memory_space<vmem>>, vector<8x32xf32>,
    %c0_4 = arith.constant 0 : index
    %c0_5 = arith.constant 0 : index
    %c0_6 = arith.constant 0 : index
    %c0_7 = arith.constant 0 : index
    %3 = vector.load %arg3[%c0_4, %c0_5, %c0_6, %c0_7] : memref<1x1x3x32xf32, #tpu.memory_space<vmem>>, vector<1x1x3x32xf32>
    %4 = vector.shape_cast %3 : vector<1x1x3x32xf32> to vector<3x32xf32>
    %c8 = arith.constant 8 : index
    %c0_8 = arith.constant 0 : index
    %5 = vector.load %arg8[%c8, %c0_8] : memref<11x32xf32, #tpu.memory_space<vmem>>, vector<3x32xf32>
    tpu.vector_store %arg8[%c8, %c0_8], %4 {strides = array<i32>} : memref<11x32xf32, #tpu.memory_space<vmem>>, vector<3x32xf32>,
    %c0_9 = arith.constant 0 : index
    %c0_10 = arith.constant 0 : index
    %6 = vector.load %arg5[%c0_9, %c0_10] : memref<32x32xf32, #tpu.memory_space<vmem>>, vector<32x32xf32>
    %c0_11 = arith.constant 0 : index
    %c0_12 = arith.constant 0 : index
    %7 = vector.load %arg6[%c0_11, %c0_12] : memref<1x32xf32, #tpu.memory_space<vmem>>, vector<1x32xf32>
    %cst = arith.constant 0.000000e+00 : f32
    %8 = vector.broadcast %cst : f32 to vector<8x32xf32>
    %c0_13 = arith.constant 0 : index
    %c0_14 = arith.constant 0 : index
    %9 = vector.load %arg9[%c0_13, %c0_14] : memref<8x32xf32, #tpu.memory_space<vmem>>, vector<8x32xf32>
    tpu.vector_store %arg9[%c0_13, %c0_14], %8 {strides = array<i32>} : memref<8x32xf32, #tpu.memory_space<vmem>>, vector<8x32xf32>,
    %c0_15 = arith.constant 0 : index
    %c0_16 = arith.constant 0 : index
    %10 = vector.load %arg8[%c0_15, %c0_16] : memref<11x32xf32, #tpu.memory_space<vmem>>, vector<8x32xf32>
    %c0_17 = arith.constant 0 : index
    %c0_18 = arith.constant 0 : index
    %11 = vector.load %arg9[%c0_17, %c0_18] : memref<8x32xf32, #tpu.memory_space<vmem>>, vector<8x32xf32>
    %c0_19 = arith.constant 0 : index
    %c0_20 = arith.constant 0 : index
    %c0_21 = arith.constant 0 : index
    %12 = vector.load %arg4[%c0_19, %c0_20, %c0_21] : memref<4x32x32xf32, #tpu.memory_space<vmem>>, vector<1x32x32xf32>
    %13 = vector.shape_cast %12 : vector<1x32x32xf32> to vector<32x32xf32>
    %cst_22 = arith.constant dense<0.000000e+00> : vector<8x32xf32>
    %14 = tpu.matmul %10, %13, %cst_22 {dimension_numbers = #tpu.dot_dimension_numbers<[1], [0], [0], [1], [0, 0, 1, 1], [], []>} : vector<8x32xf32>, vector<32x32xf32>, vector<8x32xf32> -> vector<8x32xf32>
    %15 = arith.addf %11, %14 : vector<8x32xf32>
    %c0_23 = arith.constant 0 : index
    %c0_24 = arith.constant 0 : index
    %16 = vector.load %arg9[%c0_23, %c0_24] : memref<8x32xf32, #tpu.memory_space<vmem>>, vector<8x32xf32>
    tpu.vector_store %arg9[%c0_23, %c0_24], %15 {strides = array<i32>} : memref<8x32xf32, #tpu.memory_space<vmem>>, vector<8x32xf32>,
    %c0_25 = arith.constant 0 : index
    %c0_26 = arith.constant 0 : index
    %17 = vector.load %arg9[%c0_25, %c0_26] : memref<8x32xf32, #tpu.memory_space<vmem>>, vector<8x32xf32>
    %cst_27 = arith.constant 0.000000e+00 : f32
    %18 = vector.broadcast %cst_27 : f32 to vector<8x32xf32>
    %19 = arith.maximumf %17, %18 : vector<8x32xf32>
    %cst_28 = arith.constant dense<0.000000e+00> : vector<8x32xf32>
    %20 = tpu.matmul %19, %6, %cst_28 {dimension_numbers = #tpu.dot_dimension_numbers<[1], [0], [0], [1], [0, 0, 1, 1], [], []>} : vector<8x32xf32>, vector<32x32xf32>, vector<8x32xf32> -> vector<8x32xf32>
    %21 = vector.broadcast %7 : vector<1x32xf32> to vector<8x32xf32>
    %22 = arith.addf %20, %21 : vector<8x32xf32>
    %c0_29 = arith.constant 0 : index
    %c0_30 = arith.constant 0 : index
    %c0_31 = arith.constant 0 : index
    %c0_32 = arith.constant 0 : index
    %23 = vector.load %arg7[%c0_29, %c0_30, %c0_31, %c0_32] : memref<1x8x4x32xf32, #tpu.memory_space<vmem>>, vector<1x8x1x32xf32>
    %24 = vector.shape_cast %23 : vector<1x8x1x32xf32> to vector<8x32xf32>
    %25 = vector.shape_cast %22 : vector<8x32xf32> to vector<1x8x1x32xf32>
    tpu.vector_store %arg7[%c0_29, %c0_30, %c0_31, %c0_32], %25 {strides = array<i32>} : memref<1x8x4x32xf32, #tpu.memory_space<vmem>>, vector<1x8x1x32xf32>,
    %c1 = arith.constant 1 : index
    %c0_33 = arith.constant 0 : index
    %26 = vector.load %arg8[%c1, %c0_33] : memref<11x32xf32, #tpu.memory_space<vmem>>, vector<8x32xf32>
    %c0_34 = arith.constant 0 : index
    %c0_35 = arith.constant 0 : index
    %27 = vector.load %arg9[%c0_34, %c0_35] : memref<8x32xf32, #tpu.memory_space<vmem>>, vector<8x32xf32>
    %c1_36 = arith.constant 1 : index
    %c0_37 = arith.constant 0 : index
    %c0_38 = arith.constant 0 : index
    %28 = vector.load %arg4[%c1_36, %c0_37, %c0_38] : memref<4x32x32xf32, #tpu.memory_space<vmem>>, vector<1x32x32xf32>
    %29 = vector.shape_cast %28 : vector<1x32x32xf32> to vector<32x32xf32>
    %cst_39 = arith.constant dense<0.000000e+00> : vector<8x32xf32>
    %30 = tpu.matmul %26, %29, %cst_39 {dimension_numbers = #tpu.dot_dimension_numbers<[1], [0], [0], [1], [0, 0, 1, 1], [], []>} : vector<8x32xf32>, vector<32x32xf32>, vector<8x32xf32> -> vector<8x32xf32>
    %31 = arith.addf %27, %30 : vector<8x32xf32>
    %c0_40 = arith.constant 0 : index
    %c0_41 = arith.constant 0 : index
    %32 = vector.load %arg9[%c0_40, %c0_41] : memref<8x32xf32, #tpu.memory_space<vmem>>, vector<8x32xf32>
    tpu.vector_store %arg9[%c0_40, %c0_41], %31 {strides = array<i32>} : memref<8x32xf32, #tpu.memory_space<vmem>>, vector<8x32xf32>,
    %c0_42 = arith.constant 0 : index
    %c0_43 = arith.constant 0 : index
    %33 = vector.load %arg9[%c0_42, %c0_43] : memref<8x32xf32, #tpu.memory_space<vmem>>, vector<8x32xf32>
    %cst_44 = arith.constant 0.000000e+00 : f32
    %34 = vector.broadcast %cst_44 : f32 to vector<8x32xf32>
    %35 = arith.maximumf %33, %34 : vector<8x32xf32>
    %cst_45 = arith.constant dense<0.000000e+00> : vector<8x32xf32>
    %36 = tpu.matmul %35, %6, %cst_45 {dimension_numbers = #tpu.dot_dimension_numbers<[1], [0], [0], [1], [0, 0, 1, 1], [], []>} : vector<8x32xf32>, vector<32x32xf32>, vector<8x32xf32> -> vector<8x32xf32>
    %37 = vector.broadcast %7 : vector<1x32xf32> to vector<8x32xf32>
    %38 = arith.addf %36, %37 : vector<8x32xf32>
    %c0_46 = arith.constant 0 : index
    %c0_47 = arith.constant 0 : index
    %c1_48 = arith.constant 1 : index
    %c0_49 = arith.constant 0 : index
    %39 = vector.load %arg7[%c0_46, %c0_47, %c1_48, %c0_49] : memref<1x8x4x32xf32, #tpu.memory_space<vmem>>, vector<1x8x1x32xf32>
    %40 = vector.shape_cast %39 : vector<1x8x1x32xf32> to vector<8x32xf32>
    %41 = vector.shape_cast %38 : vector<8x32xf32> to vector<1x8x1x32xf32>
    tpu.vector_store %arg7[%c0_46, %c0_47, %c1_48, %c0_49], %41 {strides = array<i32>} : memref<1x8x4x32xf32, #tpu.memory_space<vmem>>, vector<1x8x1x32xf32>,
    %c2 = arith.constant 2 : index
    %c0_50 = arith.constant 0 : index
    %42 = vector.load %arg8[%c2, %c0_50] : memref<11x32xf32, #tpu.memory_space<vmem>>, vector<8x32xf32>
    %c0_51 = arith.constant 0 : index
    %c0_52 = arith.constant 0 : index
    %43 = vector.load %arg9[%c0_51, %c0_52] : memref<8x32xf32, #tpu.memory_space<vmem>>, vector<8x32xf32>
    %c2_53 = arith.constant 2 : index
    %c0_54 = arith.constant 0 : index
    %c0_55 = arith.constant 0 : index
    %44 = vector.load %arg4[%c2_53, %c0_54, %c0_55] : memref<4x32x32xf32, #tpu.memory_space<vmem>>, vector<1x32x32xf32>
    %45 = vector.shape_cast %44 : vector<1x32x32xf32> to vector<32x32xf32>
    %cst_56 = arith.constant dense<0.000000e+00> : vector<8x32xf32>
    %46 = tpu.matmul %42, %45, %cst_56 {dimension_numbers = #tpu.dot_dimension_numbers<[1], [0], [0], [1], [0, 0, 1, 1], [], []>} : vector<8x32xf32>, vector<32x32xf32>, vector<8x32xf32> -> vector<8x32xf32>
    %47 = arith.addf %43, %46 : vector<8x32xf32>
    %c0_57 = arith.constant 0 : index
    %c0_58 = arith.constant 0 : index
    %48 = vector.load %arg9[%c0_57, %c0_58] : memref<8x32xf32, #tpu.memory_space<vmem>>, vector<8x32xf32>
    tpu.vector_store %arg9[%c0_57, %c0_58], %47 {strides = array<i32>} : memref<8x32xf32, #tpu.memory_space<vmem>>, vector<8x32xf32>,
    %c0_59 = arith.constant 0 : index
    %c0_60 = arith.constant 0 : index
    %49 = vector.load %arg9[%c0_59, %c0_60] : memref<8x32xf32, #tpu.memory_space<vmem>>, vector<8x32xf32>
    %cst_61 = arith.constant 0.000000e+00 : f32
    %50 = vector.broadcast %cst_61 : f32 to vector<8x32xf32>
    %51 = arith.maximumf %49, %50 : vector<8x32xf32>
    %cst_62 = arith.constant dense<0.000000e+00> : vector<8x32xf32>
    %52 = tpu.matmul %51, %6, %cst_62 {dimension_numbers = #tpu.dot_dimension_numbers<[1], [0], [0], [1], [0, 0, 1, 1], [], []>} : vector<8x32xf32>, vector<32x32xf32>, vector<8x32xf32> -> vector<8x32xf32>
    %53 = vector.broadcast %7 : vector<1x32xf32> to vector<8x32xf32>
    %54 = arith.addf %52, %53 : vector<8x32xf32>
    %c0_63 = arith.constant 0 : index
    %c0_64 = arith.constant 0 : index
    %c2_65 = arith.constant 2 : index
    %c0_66 = arith.constant 0 : index
    %55 = vector.load %arg7[%c0_63, %c0_64, %c2_65, %c0_66] : memref<1x8x4x32xf32, #tpu.memory_space<vmem>>, vector<1x8x1x32xf32>
    %56 = vector.shape_cast %55 : vector<1x8x1x32xf32> to vector<8x32xf32>
    %57 = vector.shape_cast %54 : vector<8x32xf32> to vector<1x8x1x32xf32>
    tpu.vector_store %arg7[%c0_63, %c0_64, %c2_65, %c0_66], %57 {strides = array<i32>} : memref<1x8x4x32xf32, #tpu.memory_space<vmem>>, vector<1x8x1x32xf32>,
    %c3 = arith.constant 3 : index
    %c0_67 = arith.constant 0 : index
    %58 = vector.load %arg8[%c3, %c0_67] : memref<11x32xf32, #tpu.memory_space<vmem>>, vector<8x32xf32>
    %c0_68 = arith.constant 0 : index
    %c0_69 = arith.constant 0 : index
    %59 = vector.load %arg9[%c0_68, %c0_69] : memref<8x32xf32, #tpu.memory_space<vmem>>, vector<8x32xf32>
    %c3_70 = arith.constant 3 : index
    %c0_71 = arith.constant 0 : index
    %c0_72 = arith.constant 0 : index
    %60 = vector.load %arg4[%c3_70, %c0_71, %c0_72] : memref<4x32x32xf32, #tpu.memory_space<vmem>>, vector<1x32x32xf32>
    %61 = vector.shape_cast %60 : vector<1x32x32xf32> to vector<32x32xf32>
    %cst_73 = arith.constant dense<0.000000e+00> : vector<8x32xf32>
    %62 = tpu.matmul %58, %61, %cst_73 {dimension_numbers = #tpu.dot_dimension_numbers<[1], [0], [0], [1], [0, 0, 1, 1], [], []>} : vector<8x32xf32>, vector<32x32xf32>, vector<8x32xf32> -> vector<8x32xf32>
    %63 = arith.addf %59, %62 : vector<8x32xf32>
    %c0_74 = arith.constant 0 : index
    %c0_75 = arith.constant 0 : index
    %64 = vector.load %arg9[%c0_74, %c0_75] : memref<8x32xf32, #tpu.memory_space<vmem>>, vector<8x32xf32>
    tpu.vector_store %arg9[%c0_74, %c0_75], %63 {strides = array<i32>} : memref<8x32xf32, #tpu.memory_space<vmem>>, vector<8x32xf32>,
    %c0_76 = arith.constant 0 : index
    %c0_77 = arith.constant 0 : index
    %65 = vector.load %arg9[%c0_76, %c0_77] : memref<8x32xf32, #tpu.memory_space<vmem>>, vector<8x32xf32>
    %cst_78 = arith.constant 0.000000e+00 : f32
    %66 = vector.broadcast %cst_78 : f32 to vector<8x32xf32>
    %67 = arith.maximumf %65, %66 : vector<8x32xf32>
    %cst_79 = arith.constant dense<0.000000e+00> : vector<8x32xf32>
    %68 = tpu.matmul %67, %6, %cst_79 {dimension_numbers = #tpu.dot_dimension_numbers<[1], [0], [0], [1], [0, 0, 1, 1], [], []>} : vector<8x32xf32>, vector<32x32xf32>, vector<8x32xf32> -> vector<8x32xf32>
    %69 = vector.broadcast %7 : vector<1x32xf32> to vector<8x32xf32>
    %70 = arith.addf %68, %69 : vector<8x32xf32>
    %c0_80 = arith.constant 0 : index
    %c0_81 = arith.constant 0 : index
    %c3_82 = arith.constant 3 : index
    %c0_83 = arith.constant 0 : index
    %71 = vector.load %arg7[%c0_80, %c0_81, %c3_82, %c0_83] : memref<1x8x4x32xf32, #tpu.memory_space<vmem>>, vector<1x8x1x32xf32>
    %72 = vector.shape_cast %71 : vector<1x8x1x32xf32> to vector<8x32xf32>
    %73 = vector.shape_cast %70 : vector<8x32xf32> to vector<1x8x1x32xf32>
    tpu.vector_store %arg7[%c0_80, %c0_81, %c3_82, %c0_83], %73 {strides = array<i32>} : memref<1x8x4x32xf32, #tpu.memory_space<vmem>>, vector<1x8x1x32xf32>,
    return
  }
  func.func @transform_0(%arg0: i32, %arg1: i32) -> (i32, i32, i32) {
    %c0_i32 = arith.constant 0 : i32
    %c0_i32_0 = arith.constant 0 : i32
    return %arg0, %arg1, %c0_i32 : i32, i32, i32
  }
  func.func @transform_1(%arg0: i32, %arg1: i32) -> (i32, i32, i32, i32) {
    %c0_i32 = arith.constant 0 : i32
    %c0_i32_0 = arith.constant 0 : i32
    %c0_i32_1 = arith.constant 0 : i32
    return %arg0, %arg1, %c0_i32, %c0_i32_0 : i32, i32, i32, i32
  }
  func.func @transform_2(%arg0: i32, %arg1: i32) -> (i32, i32, i32) {
    %c0_i32 = arith.constant 0 : i32
    %c0_i32_0 = arith.constant 0 : i32
    %c0_i32_1 = arith.constant 0 : i32
    %c0_i32_2 = arith.constant 0 : i32
    return %c0_i32, %c0_i32_0, %c0_i32_1 : i32, i32, i32
  }
  func.func @transform_3(%arg0: i32, %arg1: i32) -> (i32, i32) {
    %c0_i32 = arith.constant 0 : i32
    %c0_i32_0 = arith.constant 0 : i32
    %c0_i32_1 = arith.constant 0 : i32
    return %c0_i32, %c0_i32_0 : i32, i32
  }
  func.func @transform_4(%arg0: i32, %arg1: i32) -> (i32, i32) {
    %c0_i32 = arith.constant 0 : i32
    %c0_i32_0 = arith.constant 0 : i32
    %c0_i32_1 = arith.constant 0 : i32
    return %c0_i32, %c0_i32_0 : i32, i32
  }
  func.func @transform_5(%arg0: i32, %arg1: i32) -> (i32, i32, i32, i32) {
    %c0_i32 = arith.constant 0 : i32
    %c0_i32_0 = arith.constant 0 : i32
    %c0_i32_1 = arith.constant 0 : i32
    return %arg0, %arg1, %c0_i32, %c0_i32_0 : i32, i32, i32, i32
  }
}

</mosaic_0001>

<bundles_post_ra>
// kernel: tpu_custom_call.1
= control target key start
LH: loop header
LB: loop body
LE: loop exit
PB: predicated region body
PF: predicated region fallthrough
CT: control target
= control target key end

     0   :  { %s2462_s0 = inlined_call_operand.hbm [shape: f32[2,8,32], index: 0, kind: input, shape index: {}]   ;;  %s2463_s1 = inlined_call_operand.hbm [shape: f32[2,1,3,32], index: 1, kind: input, shape index: {}]   ;;  %s2464_s2 = inlined_call_operand.hbm [shape: f32[4,32,32], index: 2, kind: input, shape index: {}]   ;;  %s2465_s3 = inlined_call_operand.hbm [shape: f32[32,32], index: 3, kind: input, shape index: {}]   ;;  %s2466_s4 = inlined_call_operand.hbm [shape: f32[1,32], index: 4, kind: input, shape index: {}]   ;;  %s2467_s5 = inlined_call_operand.hbm [shape: f32[2,8,4,32], index: 5, kind: output, shape index: {}]  }
   0x1   :  { %2473 = sst [smem:[#allocation20_spill]] %s2462_s0 }
   0x2   :  { %2474 = sst [smem:[#allocation21_spill]] %s2464_s2 }
   0x3   :  { %10 = vsyncpa [#allocation5], 0 }
   0x4   :  { %12 = vsyncpa [#allocation5 + $0x1], 0 }
   0x5   :  { %13 = vsyncpa [#allocation8], 0 }
   0x6   :  { %15 = vsyncpa [#allocation8 + $0x1], 0 }
   0x7   :  { %16 = vsyncpa [#allocation11], 0 }
   0x8   :  { %17 = vsyncpa [#allocation6], 0 }
   0x9   :  { %19 = vsyncpa [#allocation6 + $0x1], 0  ;;  %s2001_s18 = smov 0   ;;  %s2003_s19 = smov 0  }
   0xa   :  { %s2005_s20 = smov 0   ;;  %s2007_s21 = smov 0  }
   0xb   :  { %s2009_s22 = smov 0   ;;  %s2011_s23 = smov 0  }
   0xc LB: > { %s2032_s24 = sadd.s32 4294967295, %s1955_s23   ;;  %s1403_s25 = sadd.s32 4294967294, %s1955_s23   ;;  %s1955_s23 = sphi %s2011_s23, %s25_s23   ;;  %s1951_s22 = sphi %s2009_s22, %s2501_s22   ;;  %s1947_s21 = sphi %s2007_s21, %s2500_s21   ;;  %s1943_s20 = sphi %s2005_s20, %s2499_s20   ;;  %s1939_s19 = sphi %s2003_s19, %s2498_s19   ;;  %s1935_s18 = sphi %s2001_s18, %s2497_s18  }
   0xd   : > { %p59_p0 = scmp.ne.s32.totalorder %s1939_s19, %s1935_s18  ;;  %p2468_p1 = scmp.eq.s32.totalorder %s2032_s24, 0 }
   0xe   : > { %p182_p3 = scmp.eq.s32.totalorder %s1403_s25, 1  ;;  %p1404_p5 = scmp.ge.s32.totalorder %s1955_s23, 1 }
   0xf   : > { %p2041_p4 = por %p2468_p1, %p59_p0  ;;  %p189_p7 = scmp.lt.s32.totalorder %s1955_s23, 3 }
  0x10   : > { %p2046_p6 = por %p182_p3, %p59_p0  ;;  %s1957_s29 = smov [#allocation9]  }
  0x11   : > { %s2475_s26 = scalar_select %p2041_p4, 1, 0 }
  0x12   : > { %s2476_s27 = scalar_select %p2046_p6, 1, 0 }
  0x13   : > { %p2051_p8 = pnand %p1404_p5, %p189_p7  ;;  %s201_s30 = sshll.u32 %s1957_s29, 4  ;;  %s2055_s30 = int_to_ptr.vmem [resolvable:$true] %s201_s30 }
  0x14   : > { %2477 = sst [smem:[#allocation19_spill]] %s2476_s27  ;;  %s1958_s7 = smov [#allocation10]  }
  0x15   : > { %s2478_s28 = scalar_select %p2051_p8, 1, 0 }
  0x16   : > { %p1629_p9 = pneg %p2051_p8  ;;  %s214_s8 = sshll.u32 %s1958_s7, 4  ;;  %s2066_s8 = int_to_ptr.vmem [resolvable:$true] %s214_s8 }
  0x17   : > { %s1959_s9 = smov [#allocation12]   ;;  %s2480_s2 = sld [smem:[#allocation21_spill]] }
  0x18   : > { %p2062_p11 = pnand %p1629_p9, %p2468_p1  ;;  %s2068_s10 = sshll.u32 %s1959_s9, 4  ;;  %s229_s10 = int_to_ptr.vmem [resolvable:$true] %s2068_s10 }
  0x1a   : > { %p2078_p13 = pneg %p2062_p11 }
  0x1d   : > { %s1717_s13 = scalar_lea.hbm %s2480_s2, 2048 }
  0x1e   : > { %p1718_p12 = scmp.ne.s32.totalorder %s2480_s2, %s1717_s13  ;;  %p1724_p5 = scmp.lt.u32.totalorder %s1717_s13, %s2480_s2 }
  0x20   : > { %p1720_p0 = pnand %p2078_p13, %p1718_p12 }
  0x22   : > { %p1721_p3 = pneg %p1720_p0 }
  0x24   : > { %p1726_p7 = pnand %p1724_p5, %p1721_p3 }
  0x26   : > { %1729 = shalt.err (!%p1726_p7)
}
  0x27   : > { %s1730_s29 = scalar_lea.vmem %s2055_s30, 2048  ;;  %p1738_p2 = scmp.lt.s32.totalorder %s2055_s30, %s2055_s30 }
  0x28   : > { %p1731_p9 = scmp.ne.s32.totalorder %s2055_s30, %s1730_s29  ;;  %p1739_p6 = scmp.lt.s32.totalorder %s1730_s29, %s1730_s29 }
  0x2a   : > { %p1733_p10 = pnand %p1731_p9, %p2078_p13  ;;  %p1740_p12 = por %p1739_p6, %p1738_p2 }
  0x2c   : > { %p1734_p1 = pneg %p1733_p10 }
  0x2e   : > { %p1741_p0 = pnand %p1740_p12, %p1734_p1 }
  0x30   : > { %1744 = shalt.err (!%p1741_p0)
}
  0x31   : > { %s1960_s7 = smov 128   ;;  %s1961_s9 = smov 8  }
  0x32   : > { %1632 = dma.hbm_to_vmem [thread:$0]  (!%p2062_p11), %s2480_s2, 2048, %s2055_s30, [#allocation8], %s1960_s7, %s1960_s7, %s1961_s9  }
  0x33   : > { %s1745_s15 = scalar_lea.hbm %s2465_s3, 512 }
  0x34   : > { %p1746_p2 = scmp.ne.s32.totalorder %s2465_s3, %s1745_s15  ;;  %p1752_p10 = scmp.lt.u32.totalorder %s1745_s15, %s2465_s3 }
  0x36   : > { %p1748_p1 = pnand %p1746_p2, %p2078_p13 }
  0x38   : > { %p1749_p6 = pneg %p1748_p1 }
  0x3a   : > { %p1754_p3 = pnand %p1752_p10, %p1749_p6 }
  0x3c   : > { %1757 = shalt.err (!%p1754_p3)
}
  0x3d   : > { %s1758_s30 = scalar_lea.vmem %s2066_s8, 512  ;;  %p1766_p12 = scmp.lt.s32.totalorder %s2066_s8, %s2066_s8 }
  0x3e   : > { %p1759_p5 = scmp.ne.s32.totalorder %s2066_s8, %s1758_s30  ;;  %p1767_p0 = scmp.lt.s32.totalorder %s1758_s30, %s1758_s30 }
  0x40   : > { %p1761_p7 = pnand %p1759_p5, %p2078_p13  ;;  %p1768_p2 = por %p1767_p0, %p1766_p12 }
  0x42   : > { %p1762_p9 = pneg %p1761_p7 }
  0x44   : > { %p1769_p1 = pnand %p1768_p2, %p1762_p9 }
  0x46   : > { %1772 = shalt.err (!%p1769_p1)
}
  0x47   : > { %1635 = dma.hbm_to_vmem [thread:$0]  (!%p2062_p11), %s2465_s3, 512, %s2066_s8, [#allocation11], %s1960_s7, %s1960_s7, %s1961_s9  }
  0x48   : > { %s1773_s14 = scalar_lea.hbm %s2466_s4, 16 }
  0x49   : > { %p1774_p6 = scmp.ne.s32.totalorder %s2466_s4, %s1773_s14  ;;  %p1780_p5 = scmp.lt.u32.totalorder %s1773_s14, %s2466_s4 }
  0x4b   : > { %p1776_p10 = pnand %p1774_p6, %p2078_p13 }
  0x4d   : > { %p1777_p3 = pneg %p1776_p10 }
  0x4f   : > { %p1782_p7 = pnand %p1780_p5, %p1777_p3 }
  0x51   : > { %1785 = shalt.err (!%p1782_p7)
}
  0x52   : > { %s1786_s30 = scalar_lea.vmem %s229_s10, 16  ;;  %s1793_s8 = scalar_lea.vmem %s229_s10, 32 }
  0x53   : > { %p1787_p9 = scmp.ne.s32.totalorder %s229_s10, %s1786_s30  ;;  %p1794_p2 = scmp.lt.s32.totalorder %s229_s10, %s229_s10 }
  0x54   : > { %p1795_p1 = scmp.lt.s32.totalorder %s1793_s8, %s1786_s30 }
  0x55   : > { %p1789_p12 = pnand %p1787_p9, %p2078_p13 }
  0x56   : > { %p1796_p4 = por %p1795_p1, %p1794_p2 }
  0x57   : > { %p1790_p0 = pneg %p1789_p12 }
  0x59   : > { %p1797_p8 = pnand %p1796_p4, %p1790_p0 }
  0x5b   : > { %1800 = shalt.err (!%p1797_p8)
}
  0x5c   : > { %1638 = dma.hbm_to_vmem [thread:$0]  (!%p2062_p11), %s2466_s4, 16, %s229_s10, [#allocation11]  }
  0x5d   : > { %s46_s16 = sadd.s32 1, %s1943_s20  ;;  %s37_s27 = sadd.s32 1, %s1951_s22 }
  0x5e   : > { %p53_p4 = scmp.ne.s32.totalorder %s1943_s20, %s1939_s19  ;;  %p39_p8 = scmp.ge.s32.totalorder %s37_s27, 2 }
  0x5f   : > { %p54_p13 = scmp.eq.s32.totalorder %s1955_s23, 0  ;;  %p2482_p6 = scmp.eq.s32.totalorder %s2032_s24, 1 }
  0x60   : > { %p1653_p3 = scmp.lt.s32.totalorder %s1955_s23, 2  ;;  %s2503_s27 = smov (%p39_p8, %s37_s27), 0 }
  0x61   : > { %p2148_p10 = por %p2482_p6, %p53_p4  ;;  %p55_p5 = por %p54_p13, %p53_p4 }
  0x62   : > { %s2156_s11 = sand.u32 1, %s1943_s20   ;;  %s41_s10 = ssub.s32 %s1951_s22, %s2503_s27 }
  0x63   : > { %s2483_s6 = scalar_select %p2148_p10, 1, 0 }
  0x64   : > { %p44_p11 = scmp.eq.s32.totalorder %s41_s10, 0  ;;  %s1409_s12 = sshll.u32 %s2156_s11, 3 }
  0x65   : > { %s1410_s13 = sshll.u32 %s1951_s22, 7  ;;  %s2484_s0 = sld [smem:[#allocation20_spill]] }
  0x66   : > { %s2163_s14 = scalar_select %p44_p11, %s1943_s20, %s46_s16  }
  0x67   : > { %s243_s29 = scalar_lea.vmem [#allocation4], %s1409_s12  ;;  %p2174_p7 = pnand %p1653_p3, %p55_p5 }
  0x68   : > { %s251_s30 = sshll.u32 %s243_s29, 4  ;;  %s1411_s9 = sshll.u32 %s2156_s11, 2  ;;  %s2170_s30 = int_to_ptr.vmem [resolvable:$true] %s251_s30 }
  0x69   : > { %s240_s16 = scalar_lea.sflag [#allocation5], %s2156_s11  ;;  %p1803_p12 = pneg %p2174_p7 }
  0x6b   : > { %s2168_s25 = scalar_lea.hbm %s2484_s0, %s1410_s13  ;;  %s1806_s15 = scalar_lea.hbm %s2484_s0, 256 }
  0x6c   : > { %s1801_s10 = scalar_lea.hbm %s2168_s25, 128  ;;  %p1807_p1 = scmp.lt.u32.totalorder %s2168_s25, %s2484_s0 }
  0x6d   : > { %p1802_p9 = scmp.ne.s32.totalorder %s2168_s25, %s1801_s10  ;;  %p1808_p4 = scmp.lt.u32.totalorder %s1806_s15, %s1801_s10 }
  0x6e   : > { %p1810_p13 = scmp.lt.u32.totalorder %s1801_s10, %s2168_s25 }
  0x6f   : > { %p1804_p0 = pnand %p1803_p12, %p1802_p9  ;;  %p1809_p8 = por %p1808_p4, %p1807_p1 }
  0x71   : > { %p1805_p2 = pneg %p1804_p0  ;;  %p1811_p6 = por %p1810_p13, %p1809_p8 }
  0x73   : > { %p1812_p3 = pnand %p1811_p6, %p1805_p2 }
  0x75   : > { %1815 = shalt.err (!%p1812_p3)
}
  0x76   : > { %s1816_s7 = scalar_lea.vmem %s2170_s30, 128  ;;  %s1962_s12 = smov [#allocation4]  }
  0x77   : > { %p1817_p5 = scmp.ne.s32.totalorder %s2170_s30, %s1816_s7  ;;  %s1821_s13 = sshll.u32 %s1962_s12, 4  ;;  %s1822_s13 = int_to_ptr.vmem [resolvable:$false] %s1821_s13 }
  0x78   : > { %s1823_s17 = scalar_lea.vmem %s1822_s13, 256  ;;  %p1824_p0 = scmp.lt.s32.totalorder %s2170_s30, %s1822_s13 }
  0x79   : > { %p1819_p11 = pnand %p1817_p5, %p1803_p12  ;;  %p1825_p1 = scmp.lt.s32.totalorder %s1823_s17, %s1816_s7 }
  0x7b   : > { %p1820_p9 = pneg %p1819_p11  ;;  %p1826_p4 = por %p1825_p1, %p1824_p0 }
  0x7d   : > { %p1827_p8 = pnand %p1826_p4, %p1820_p9 }
  0x7f   : > { %1830 = shalt.err (!%p1827_p8)
}
  0x80   : > { %1642 = dma.hbm_to_vmem [thread:$0]  (!%p2174_p7), %s2168_s25, 128, %s2170_s30, %s240_s16  }
  0x81   : > { %s1412_s10 = sshll.u32 %s1951_s22, 6  ;;  %s262_s7 = scalar_lea.vmem [#allocation7], %s1411_s9 }
  0x82   : > { %s2210_s12 = scalar_lea.hbm %s2463_s1, %s1412_s10  ;;  %s270_s13 = sshll.u32 %s262_s7, 4  ;;  %s271_s13 = int_to_ptr.vmem [resolvable:$true] %s270_s13 }
  0x83   : > { %s2486_s17 = sand.u32 1, %s1955_s23   ;;  %s1831_s2 = scalar_lea.hbm %s2210_s12, 64 }
  0x84   : > { %s259_s0 = scalar_lea.sflag [#allocation8], %s2486_s17  ;;  %p1832_p2 = scmp.ne.s32.totalorder %s2210_s12, %s1831_s2 }
  0x85   : > { %s1836_s16 = scalar_lea.hbm %s2463_s1, 128  ;;  %p1837_p3 = scmp.lt.u32.totalorder %s2210_s12, %s2463_s1 }
  0x86   : > { %p1834_p13 = pnand %p1832_p2, %p1803_p12  ;;  %p1838_p5 = scmp.lt.u32.totalorder %s1836_s16, %s1831_s2 }
  0x87   : > { %p1840_p9 = scmp.lt.u32.totalorder %s1831_s2, %s2210_s12 }
  0x88   : > { %p1835_p6 = pneg %p1834_p13  ;;  %p1839_p11 = por %p1838_p5, %p1837_p3 }
  0x8a   : > { %p1841_p0 = por %p1840_p9, %p1839_p11 }
  0x8c   : > { %p1842_p1 = pnand %p1841_p0, %p1835_p6 }
  0x8e   : > { %1845 = shalt.err (!%p1842_p1)
}
  0x8f   : > { %s1846_s9 = scalar_lea.vmem %s271_s13, 64  ;;  %s1963_s15 = smov [#allocation7]  }
  0x90   : > { %p1847_p4 = scmp.ne.s32.totalorder %s271_s13, %s1846_s9  ;;  %s1851_s29 = sshll.u32 %s1963_s15, 4  ;;  %s1852_s29 = int_to_ptr.vmem [resolvable:$false] %s1851_s29 }
  0x91   : > { %s1853_s7 = scalar_lea.vmem %s1852_s29, 128  ;;  %p1854_p13 = scmp.lt.s32.totalorder %s271_s13, %s1852_s29 }
  0x92   : > { %p1849_p8 = pnand %p1847_p4, %p1803_p12  ;;  %p1855_p10 = scmp.lt.s32.totalorder %s1853_s7, %s1846_s9 }
  0x94   : > { %p1850_p2 = pneg %p1849_p8  ;;  %p1856_p3 = por %p1855_p10, %p1854_p13 }
  0x96   : > { %p1857_p5 = pnand %p1856_p3, %p1850_p2 }
  0x98   : > { %1860 = shalt.err (!%p1857_p5)
}
  0x99   : > { %1645 = dma.hbm_to_vmem [thread:$0]  (!%p2174_p7), %s2210_s12, 64, %s271_s13, %s259_s0  }
  0x9a   : > { %p2487_p6 = scmp.ne.s32.totalorder %s2478_s28, 0 }
  0x9b   : > { %s2238_s2 = sand.u32 (!%p2487_p6), 1, %s1939_s19   ;;  %p2488_p12 = scmp.ne.s32.totalorder (!%p2487_p6), %s2475_s26, 0 }
  0x9c   : > { %279 = sbr.rel (%p2487_p6) target bundleno = 678 (0x2a6), region = 40  ;;  %s1414_s17 = sshll.u32 (!%p2487_p6), %s2238_s2, 3 }
  0x9d   : > { %s282_s25 = scalar_lea.sflag (!%p2487_p6), [#allocation5], %s2238_s2  ;;  %s285_s30 = scalar_lea.vmem (!%p2487_p6), [#allocation4], %s1414_s17 }
  0xa3   : > { %1914 = dma.done.wait (%p2488_p12), %s282_s25, 128  }
  0xa4   : > { %1916 = vsyncadd (%p2488_p12), %s282_s25, 4294967168  ;;  %s290_s0 = sand.u32 1, %s2032_s24   ;;  %s1415_s28 = sshll.u32 %s2238_s2, 2 }
  0xa5   : > { %s291_s8 = scalar_lea.sflag [#allocation8], %s290_s0  ;;  %s294_s12 = scalar_lea.vmem [#allocation7], %s1415_s28 }
  0xa6   : > { %1918 = dma.done.wait (%p2488_p12), %s291_s8, 64  }
  0xa7   : > { %1920 = vsyncadd (%p2488_p12), %s291_s8, 4294967232  ;;  %p2489_p10 = scmp.eq.s32.totalorder %s2032_s24, 0 }
  0xa9   : > { %1922 = dma.done.wait (%p2489_p10), [#allocation8], 2048   ;;  %p2490_p7 = pmov %p2489_p10 }
  0xab   : > { %1924 = vsyncadd (%p2490_p7), [#allocation8], 4294965248  ;;  %p2491_p11 = pmov %p2490_p7 }
  0xac   : > { %p2492_p9 = pmov %p2490_p7 }
  0xad   : > { %1926 = dma.done.wait (%p2491_p11), [#allocation11], 528  }
  0xae   : > { %1928 = vsyncadd (%p2492_p9), [#allocation11], 4294966768  ;;  %vm340_vm0 = vcmask 261120   ;;  %v1964_v0 = vmov 0.0|0.0   ;;  %vm1965_vm1 = vmmov 0   ;;  %v1966_v1 = vmov 0.0  }
  0xaf   : > { %1563 = vmatprep.subr.bf16.mxu0 %v1964_v0  ;;  %1483 = vmatprep.mubr.msk.f32.mxu0 %vm1965_vm1, %v1966_v1  ;;  %350 = vst.msk [vmem:[#allocation3] sm:$0xff] %vm340_vm0, %v1966_v1  ;;  %v353_v2 = vld [vmem:[#allocation9] sm:$0xff]  ;;  %v354_v3 = vld [vmem:[#allocation9 + $0x8] sm:$0xff]  ;;  %v355_v4 = vld [vmem:[#allocation9 + $0x10] sm:$0xff]  ;;  %vm343_vm2 = vcmask 256000   ;;  %v518_v61 = vlaneseq  ;;  %s1419_s24 = sshll.u32 %s2238_s2, 5 }
  0xb0   : > { %1569 = vmatprep.subr.bf16.mxu1 %v1964_v0  ;;  %1494 = vmatprep.mubr.msk.f32.mxu1 %vm1965_vm1, %v1966_v1  ;;  %v1564_v5 = vpack.c.bf16 %v354_v3, %v353_v2  ;;  %v356_v6 = vld [vmem:[#allocation9 + $0x18] sm:$0xff]  ;;  %v339_v7 = vld [vmem:[%s285_s30] sm:$0xff]  ;;  %v583_v10 = vld [vmem:[#allocation9 + $0x20] sm:$0xff]  ;;  %v1967_v59 = vmov 1966171168   ;;  %vm571_vm3 = vcmask 253952  }
  0xb1   : > { %341 = vst.msk [vmem:[#allocation2] sm:$0xff] %vm340_vm0, %v339_v7  ;;  %v1567_v8 = vpack.c.bf16 %v356_v6, %v355_v4  ;;  %v342_v9 = vld [vmem:[%s294_s12] sm:$0x7]  ;;  %v584_v11 = vld [vmem:[#allocation9 + $0x28] sm:$0xff]  ;;  %v585_v13 = vld [vmem:[#allocation9 + $0x30] sm:$0xff]  ;;  %v516_v60 = vunpack.c.l.s4 %v1967_v59  ;;  %v519_v63 = vshrl.u32 %v518_v61, 7 }
  0xb2   : > { %1565 = vmatpush3.bf16.msra.mxu0 %v1564_v5  ;;  %344 = vst.msk [vmem:[#allocation2 + $0x8] sm:$0x7] %vm343_vm2, %v342_v9  ;;  %v1576_v12 = vpack.c.bf16 %v584_v11, %v583_v10  ;;  %v586_v14 = vld [vmem:[#allocation9 + $0x38] sm:$0xff]  ;;  %v806_v17 = vld [vmem:[#allocation9 + $0x40] sm:$0xff]  ;;  %v807_v18 = vld [vmem:[#allocation9 + $0x48] sm:$0xff]  ;;  %s2318_s26 = scalar_lea.vmem [#allocation13], %s1419_s24 }
  0xb3   : > { %1566 = vmatprep.subr.bf16.mxu0 %v1964_v0  ;;  %v1579_v16 = vpack.c.bf16 %v586_v14, %v585_v13  ;;  %v1588_v20 = vpack.c.bf16 %v807_v18, %v806_v17  ;;  %v808_v21 = vld [vmem:[#allocation9 + $0x50] sm:$0xff]  ;;  %v809_v22 = vld [vmem:[#allocation9 + $0x58] sm:$0xff]  ;;  %v1029_v24 = vld [vmem:[#allocation9 + $0x60] sm:$0xff]  ;;  %v517_v62 = vunpack.c.0.s8 %v516_v60  ;;  %s1434_s13 = sshll.u32 %s1947_s21, 9  ;;  %s1265_s16 = sshll.u32 %s2318_s26, 4  ;;  %s2405_s16 = int_to_ptr.vmem [resolvable:$true] %s1265_s16 }
  0xb4   : > { %v1591_v23 = vpack.c.bf16 %v809_v22, %v808_v21  ;;  %v1030_v25 = vld [vmem:[#allocation9 + $0x68] sm:$0xff]  ;;  %v1031_v28 = vld [vmem:[#allocation9 + $0x70] sm:$0xff]  ;;  %v1032_v29 = vld [vmem:[#allocation9 + $0x78] sm:$0xff]  ;;  %s2403_s9 = scalar_lea.hbm %s2467_s5, %s1434_s13  ;;  %s1250_s21 = scalar_lea.sflag [#allocation6], %s2238_s2 }
  0xb5   : > { %v1600_v27 = vpack.c.bf16 %v1030_v25, %v1029_v24  ;;  %v1603_v30 = vpack.c.bf16 %v1032_v29, %v1031_v28  ;;  %v345_v32 = vld [vmem:[#allocation10] sm:$0xff]  ;;  %v346_v33 = vld [vmem:[#allocation10 + $0x8] sm:$0xff]  ;;  %v347_v35 = vld [vmem:[#allocation10 + $0x10] sm:$0xff]  ;;  %v2309_v3 = vsub.s32 %v517_v62, %v519_v63  ;;  %s1861_s15 = scalar_lea.vmem %s2405_s16, 512  ;;  %p2493_p1 = scmp.ne.s32.totalorder %s2483_s6, 0 }
  0xb6   : > { %1568 = vmatpush3.bf16.msra.mxu0 %v1567_v8  ;;  %v1570_v34 = vpack.c.bf16 %v346_v33, %v345_v32  ;;  %v348_v36 = vld [vmem:[#allocation10 + $0x18] sm:$0xff]  ;;  %v352_v38 = vld [vmem:[#allocation3] sm:$0xff]  ;;  %p1862_p0 = scmp.ne.s32.totalorder %s2405_s16, %s1861_s15  ;;  %s1968_s29 = smov [#allocation13]  }
  0xb7   : > { %1575 = vmatprep.subr.bf16.mxu0 %v1964_v0  ;;  %v1573_v37 = vpack.c.bf16 %v348_v36, %v347_v35  ;;  %v2307_v2 = vld [vmem:[#allocation12] ss:$0 sm:$0xff]  ;;  %s1865_s7 = sshll.u32 %s1968_s29, 4  ;;  %s1866_s7 = int_to_ptr.vmem [resolvable:$false] %s1865_s7 }
  0xb8   : > { %v351_v15 = vld [vmem:[#allocation2] sm:$0xff]  ;;  %1571 = vmatpush3.bf16.msra.mxu1 %v1570_v34  ;;  %p1863_p4 = pnand %p1862_p0, %p2493_p1  ;;  %s1867_s17 = scalar_lea.vmem %s1866_s7, 1024 }
  0xb9   : > { %1484 = vmatmul.mubr.msk.f32.vlgmr.msra.gmra.mrb[0].mxu0 %vm340_vm0, %v351_v15  ;;  %v580_v19 = vld [vmem:[#allocation2 + $0x1] sm:$0xff]  ;;  %1572 = vmatprep.subr.bf16.mxu1 %v1964_v0  ;;  %p1868_p2 = scmp.lt.s32.totalorder %s2405_s16, %s1866_s7  ;;  %p1869_p13 = scmp.lt.s32.totalorder %s1867_s17, %s1861_s15 }
  0xba   : > { %1577 = vmatpush3.bf16.msra.mxu0 %v1576_v12  ;;  %1505 = vmatprep.mubr.msk.f32.mxu0 %vm1965_vm1, %v1966_v1  ;;  %v803_v26 = vld [vmem:[#allocation2 + $0x2] sm:$0xff]  ;;  %p1864_p8 = pneg %p1863_p4 }
  0xbb   : > { %1578 = vmatprep.subr.bf16.mxu0 %v1964_v0  ;;  %v1026_v31 = vld [vmem:[#allocation2 + $0x3] sm:$0xff]  ;;  %p1870_p3 = por %p1869_p13, %p1868_p2 }
  0xbc   : > { %1574 = vmatpush3.bf16.msra.mxu1 %v1573_v37 }
  0xbd   : > { %1581 = vmatprep.subr.bf16.mxu1 %v1964_v0  ;;  %p1871_p5 = pnand %p1870_p3, %p1864_p8 }
  0xbe   : > { %1580 = vmatpush3.bf16.msra.mxu0 %v1579_v16 }
  0xbf   : > { %1587 = vmatprep.subr.bf16.mxu0 %v1964_v0 }
  0xc1   : > { %1506 = vmatmul.mubr.msk.f32.vlgmr.msra.gmra.mrb[2].mxu0 %vm340_vm0, %v580_v19 }
  0xc2   : > { %1589 = vmatpush3.bf16.msra.mxu0 %v1588_v20  ;;  %1527 = vmatprep.mubr.msk.f32.mxu0 %vm1965_vm1, %v1966_v1 }
  0xc3   : > { %1590 = vmatprep.subr.bf16.mxu0 %v1964_v0 }
  0xc6   : > { %1592 = vmatpush3.bf16.msra.mxu0 %v1591_v23 }
  0xc7   : > { %1599 = vmatprep.subr.bf16.mxu0 %v1964_v0 }
  0xc9   : > { %1528 = vmatmul.mubr.msk.f32.vlgmr.msra.gmra.mrb[4].mxu0 %vm340_vm0, %v803_v26 }
  0xca   : > { %1601 = vmatpush3.bf16.msra.mxu0 %v1600_v27  ;;  %1549 = vmatprep.mubr.msk.f32.mxu0 %vm1965_vm1, %v1966_v1 }
  0xcb   : > { %1602 = vmatprep.subr.bf16.mxu0 %v1964_v0 }
  0xce   : > { %1604 = vmatpush3.bf16.msra.mxu0 %v1603_v30 }
  0xd1   : > { %1550 = vmatmul.mubr.msk.f32.vlgmr.msra.gmra.mrb[6].mxu0 %vm340_vm0, %v1026_v31 }
 0x18c   : > { %v426_v39 = vpop.f32.mrb[0].mxu0 }
 0x18d   : > { %v430_v40 = vadd.f32 %v426_v39, %v352_v38  ;;  %v1485_v41 = vpop.f32.mrb[1].mxu0 }
 0x18f   : > { %431 = vst.msk [vmem:[#allocation3] sm:$0xff] %vm340_vm0, %v430_v40 }
 0x194   : > { %v656_v42 = vpop.f32.mrb[2].mxu0 }
 0x195   : > { %v1507_v43 = vpop.f32.mrb[3].mxu0 }
 0x196   : > { %v581_v44 = vld [vmem:[#allocation3] sm:$0xff] }
 0x197   : > { %v660_v45 = vadd.f32 %v656_v42, %v581_v44  ;;  %v433_v46 = vmax.f32 %v581_v44, 0.0 }
 0x199   : > { %1495 = vmatmul.mubr.msk.f32.vlgmr.msra.gmra.mrb[0].mxu1 %vm340_vm0, %v433_v46  ;;  %661 = vst.msk [vmem:[#allocation3] sm:$0xff] %vm340_vm0, %v660_v45 }
 0x19a   : > { %1583 = vmatpush3.bf16.msra.mxu1 %v1570_v34  ;;  %1516 = vmatprep.mubr.msk.f32.mxu1 %vm1965_vm1, %v1966_v1 }
 0x19b   : > { %1584 = vmatprep.subr.bf16.mxu1 %v1964_v0 }
 0x19c   : > { %v879_v47 = vpop.f32.mrb[4].mxu0 }
 0x19d   : > { %v1529_v48 = vpop.f32.mrb[5].mxu0 }
 0x19e   : > { %1586 = vmatpush3.bf16.msra.mxu1 %v1573_v37 }
 0x19f   : > { %1593 = vmatprep.subr.bf16.mxu1 %v1964_v0 }
 0x1a0   : > { %v662_v49 = vld [vmem:[#allocation3] sm:$0xff] }
 0x1a1   : > { %v883_v50 = vadd.f32 %v879_v47, %v662_v49  ;;  %v663_v51 = vmax.f32 %v662_v49, 0.0 }
 0x1a3   : > { %884 = vst.msk [vmem:[#allocation3] sm:$0xff] %vm340_vm0, %v883_v50  ;;  %1517 = vmatmul.mubr.msk.f32.vlgmr.msra.gmra.mrb[2].mxu1 %vm340_vm0, %v663_v51 }
 0x1a4   : > { %1595 = vmatpush3.bf16.msra.mxu1 %v1570_v34  ;;  %v1102_v52 = vpop.f32.mrb[6].mxu0  ;;  %1538 = vmatprep.mubr.msk.f32.mxu1 %vm1965_vm1, %v1966_v1 }
 0x1a5   : > { %1596 = vmatprep.subr.bf16.mxu1 %v1964_v0  ;;  %v1551_v53 = vpop.f32.mrb[7].mxu0 }
 0x1a8   : > { %1598 = vmatpush3.bf16.msra.mxu1 %v1573_v37 }
 0x1a9   : > { %1605 = vmatprep.subr.bf16.mxu1 %v1964_v0 }
 0x1aa   : > { %v885_v54 = vld [vmem:[#allocation3] sm:$0xff] }
 0x1ab   : > { %v1106_v55 = vadd.f32 %v1102_v52, %v885_v54  ;;  %v886_v56 = vmax.f32 %v885_v54, 0.0 }
 0x1ad   : > { %1107 = vst.msk [vmem:[#allocation3] sm:$0xff] %vm340_vm0, %v1106_v55  ;;  %1539 = vmatmul.mubr.msk.f32.vlgmr.msra.gmra.mrb[4].mxu1 %vm340_vm0, %v886_v56 }
 0x1ae   : > { %1607 = vmatpush3.bf16.msra.mxu1 %v1570_v34  ;;  %1560 = vmatprep.mubr.msk.f32.mxu1 %vm1965_vm1, %v1966_v1 }
 0x1af   : > { %1608 = vmatprep.subr.bf16.mxu1 %v1964_v0 }
 0x1b2   : > { %1610 = vmatpush3.bf16.msra.mxu1 %v1573_v37 }
 0x1b4   : > { %v1108_v57 = vld [vmem:[#allocation3] sm:$0xff] }
 0x1b5   : > { %v1109_v58 = vmax.f32 %v1108_v57, 0.0 }
 0x1b7   : > { %1561 = vmatmul.mubr.msk.f32.vlgmr.msra.gmra.mrb[6].mxu1 %vm340_vm0, %v1109_v58 }
 0x26c   : > { %v509_v4 = vpop.f32.mrb[0].mxu1 }
 0x26d   : > { %v510_v1 = vadd.f32 %v2307_v2, %v509_v4  ;;  %v1496_v5 = vpop.f32.mrb[1].mxu1 }
 0x26f   : > { %v514_v0 = vcombine.high %v510_v1, %v510_v1  ;;  %v521_v6 = vrot.slane %v510_v1, %v2309_v3 }
 0x271   : > { %v528_v7 = vrot.slane %v514_v0, %v2309_v3  ;;  %v529_v8 = vcombine.high %v521_v6, %v521_v6  ;;  %v537_v9 = vrot.slane %v521_v6, %v2309_v3 }
 0x273   : > { %v530_v10 = vcombine.high %v528_v7, %v528_v7  ;;  %v544_v11 = vrot.slane %v528_v7, %v2309_v3  ;;  %v551_v12 = vrot.slane %v529_v8, %v2309_v3  ;;  %v559_v13 = vcombine.high %v537_v9, %v537_v9  ;;  %572 = vst.msk [vmem:[%s2318_s26] sm:$0x1] %vm571_vm3, %v537_v9 }
 0x275   : > { %v558_v14 = vrot.slane %v530_v10, %v2309_v3  ;;  %v560_v15 = vcombine.high %v544_v11, %v544_v11  ;;  %v561_v16 = vcombine.high %v551_v12, %v551_v12  ;;  %573 = vst.msk [vmem:[%s2318_s26 + $0x4] sm:$0x1] %vm571_vm3, %v551_v12  ;;  %574 = vst.msk [vmem:[%s2318_s26 + $0x8] sm:$0x1] %vm571_vm3, %v559_v13 }
 0x276   : > { %576 = vst.msk [vmem:[%s2318_s26 + $0x10] sm:$0x1] %vm571_vm3, %v544_v11  ;;  %v733_v17 = vpop.f32.mrb[2].mxu1 }
 0x277   : > { %v562_v18 = vcombine.high %v558_v14, %v558_v14  ;;  %575 = vst.msk [vmem:[%s2318_s26 + $0xc] sm:$0x1] %vm571_vm3, %v561_v16  ;;  %577 = vst.msk [vmem:[%s2318_s26 + $0x14] sm:$0x1] %vm571_vm3, %v558_v14  ;;  %v734_v19 = vadd.f32 %v2307_v2, %v733_v17  ;;  %v1518_v20 = vpop.f32.mrb[3].mxu1 }
 0x278   : > { %578 = vst.msk [vmem:[%s2318_s26 + $0x18] sm:$0x1] %vm571_vm3, %v560_v15 }
 0x279   : > { %579 = vst.msk [vmem:[%s2318_s26 + $0x1c] sm:$0x1] %vm571_vm3, %v562_v18  ;;  %v738_v21 = vcombine.high %v734_v19, %v734_v19  ;;  %v745_v22 = vrot.slane %v734_v19, %v2309_v3 }
 0x27b   : > { %v752_v23 = vrot.slane %v738_v21, %v2309_v3  ;;  %v753_v24 = vcombine.high %v745_v22, %v745_v22  ;;  %v761_v25 = vrot.slane %v745_v22, %v2309_v3 }
 0x27d   : > { %v754_v26 = vcombine.high %v752_v23, %v752_v23  ;;  %v768_v27 = vrot.slane %v752_v23, %v2309_v3  ;;  %v775_v28 = vrot.slane %v753_v24, %v2309_v3  ;;  %v783_v29 = vcombine.high %v761_v25, %v761_v25  ;;  %795 = vst.msk [vmem:[%s2318_s26 + $0x1] sm:$0x1] %vm571_vm3, %v761_v25 }
 0x27f   : > { %v782_v30 = vrot.slane %v754_v26, %v2309_v3  ;;  %v784_v31 = vcombine.high %v768_v27, %v768_v27  ;;  %v785_v32 = vcombine.high %v775_v28, %v775_v28  ;;  %796 = vst.msk [vmem:[%s2318_s26 + $0x5] sm:$0x1] %vm571_vm3, %v775_v28  ;;  %797 = vst.msk [vmem:[%s2318_s26 + $0x9] sm:$0x1] %vm571_vm3, %v783_v29 }
 0x280   : > { %799 = vst.msk [vmem:[%s2318_s26 + $0x11] sm:$0x1] %vm571_vm3, %v768_v27  ;;  %v956_v33 = vpop.f32.mrb[4].mxu1 }
 0x281   : > { %v786_v34 = vcombine.high %v782_v30, %v782_v30  ;;  %798 = vst.msk [vmem:[%s2318_s26 + $0xd] sm:$0x1] %vm571_vm3, %v785_v32  ;;  %800 = vst.msk [vmem:[%s2318_s26 + $0x15] sm:$0x1] %vm571_vm3, %v782_v30  ;;  %v957_v35 = vadd.f32 %v2307_v2, %v956_v33  ;;  %v1540_v36 = vpop.f32.mrb[5].mxu1 }
 0x282   : > { %801 = vst.msk [vmem:[%s2318_s26 + $0x19] sm:$0x1] %vm571_vm3, %v784_v31 }
 0x283   : > { %802 = vst.msk [vmem:[%s2318_s26 + $0x1d] sm:$0x1] %vm571_vm3, %v786_v34  ;;  %v961_v37 = vcombine.high %v957_v35, %v957_v35  ;;  %v968_v38 = vrot.slane %v957_v35, %v2309_v3 }
 0x285   : > { %v975_v39 = vrot.slane %v961_v37, %v2309_v3  ;;  %v976_v40 = vcombine.high %v968_v38, %v968_v38  ;;  %v984_v41 = vrot.slane %v968_v38, %v2309_v3 }
 0x287   : > { %v977_v42 = vcombine.high %v975_v39, %v975_v39  ;;  %v991_v43 = vrot.slane %v975_v39, %v2309_v3  ;;  %v998_v44 = vrot.slane %v976_v40, %v2309_v3  ;;  %v1006_v45 = vcombine.high %v984_v41, %v984_v41  ;;  %1018 = vst.msk [vmem:[%s2318_s26 + $0x2] sm:$0x1] %vm571_vm3, %v984_v41 }
 0x289   : > { %v1005_v46 = vrot.slane %v977_v42, %v2309_v3  ;;  %v1007_v47 = vcombine.high %v991_v43, %v991_v43  ;;  %v1008_v48 = vcombine.high %v998_v44, %v998_v44  ;;  %1019 = vst.msk [vmem:[%s2318_s26 + $0x6] sm:$0x1] %vm571_vm3, %v998_v44  ;;  %1020 = vst.msk [vmem:[%s2318_s26 + $0xa] sm:$0x1] %vm571_vm3, %v1006_v45 }
 0x28a   : > { %1022 = vst.msk [vmem:[%s2318_s26 + $0x12] sm:$0x1] %vm571_vm3, %v991_v43  ;;  %v1179_v49 = vpop.f32.mrb[6].mxu1 }
 0x28b   : > { %v1009_v50 = vcombine.high %v1005_v46, %v1005_v46  ;;  %1021 = vst.msk [vmem:[%s2318_s26 + $0xe] sm:$0x1] %vm571_vm3, %v1008_v48  ;;  %1023 = vst.msk [vmem:[%s2318_s26 + $0x16] sm:$0x1] %vm571_vm3, %v1005_v46  ;;  %v1180_v51 = vadd.f32 %v2307_v2, %v1179_v49  ;;  %v1562_v52 = vpop.f32.mrb[7].mxu1 }
 0x28c   : > { %1024 = vst.msk [vmem:[%s2318_s26 + $0x1a] sm:$0x1] %vm571_vm3, %v1007_v47 }
 0x28d   : > { %1025 = vst.msk [vmem:[%s2318_s26 + $0x1e] sm:$0x1] %vm571_vm3, %v1009_v50  ;;  %v1184_v53 = vcombine.high %v1180_v51, %v1180_v51  ;;  %v1191_v54 = vrot.slane %v1180_v51, %v2309_v3 }
 0x28f   : > { %v1198_v55 = vrot.slane %v1184_v53, %v2309_v3  ;;  %v1199_v56 = vcombine.high %v1191_v54, %v1191_v54  ;;  %v1207_v57 = vrot.slane %v1191_v54, %v2309_v3 }
 0x291   : > { %v1200_v58 = vcombine.high %v1198_v55, %v1198_v55  ;;  %v1214_v59 = vrot.slane %v1198_v55, %v2309_v3  ;;  %v1221_v60 = vrot.slane %v1199_v56, %v2309_v3  ;;  %v1229_v61 = vcombine.high %v1207_v57, %v1207_v57  ;;  %1241 = vst.msk [vmem:[%s2318_s26 + $0x3] sm:$0x1] %vm571_vm3, %v1207_v57 }
 0x293   : > { %v1228_v62 = vrot.slane %v1200_v58, %v2309_v3  ;;  %v1230_v63 = vcombine.high %v1214_v59, %v1214_v59  ;;  %v1231_v2 = vcombine.high %v1221_v60, %v1221_v60  ;;  %1242 = vst.msk [vmem:[%s2318_s26 + $0x7] sm:$0x1] %vm571_vm3, %v1221_v60  ;;  %1243 = vst.msk [vmem:[%s2318_s26 + $0xb] sm:$0x1] %vm571_vm3, %v1229_v61 }
 0x294   : > { %1245 = vst.msk [vmem:[%s2318_s26 + $0x13] sm:$0x1] %vm571_vm3, %v1214_v59 }
 0x295   : > { %v1232_v3 = vcombine.high %v1228_v62, %v1228_v62  ;;  %1244 = vst.msk [vmem:[%s2318_s26 + $0xf] sm:$0x1] %vm571_vm3, %v1231_v2  ;;  %1246 = vst.msk [vmem:[%s2318_s26 + $0x17] sm:$0x1] %vm571_vm3, %v1228_v62 }
 0x296   : > { %1247 = vst.msk [vmem:[%s2318_s26 + $0x1b] sm:$0x1] %vm571_vm3, %v1230_v63 }
 0x297   : > { %1248 = vst.msk [vmem:[%s2318_s26 + $0x1f] sm:$0x1] %vm571_vm3, %v1232_v3 }
 0x298   : > { %1874 = shalt.err (!%p1871_p5)
}
 0x299   : > { %s1875_s25 = scalar_lea.hbm %s2403_s9, 512  ;;  %s1879_s28 = scalar_lea.hbm %s2467_s5, 1024 }
 0x29a   : > { %p1876_p6 = scmp.ne.s32.totalorder %s2403_s9, %s1875_s25  ;;  %p1880_p7 = scmp.lt.u32.totalorder %s2403_s9, %s2467_s5 }
 0x29b   : > { %p1881_p11 = scmp.lt.u32.totalorder %s1879_s28, %s1875_s25  ;;  %p1883_p0 = scmp.lt.u32.totalorder %s1875_s25, %s2403_s9 }
 0x29c   : > { %p1877_p12 = pnand %p1876_p6, %p2493_p1 }
 0x29d   : > { %p1882_p9 = por %p1881_p11, %p1880_p7 }
 0x29e   : > { %p1878_p10 = pneg %p1877_p12 }
 0x29f   : > { %p1884_p4 = por %p1883_p0, %p1882_p9 }
 0x2a1   : > { %p1885_p8 = pnand %p1884_p4, %p1878_p10 }
 0x2a3   : > { %1888 = shalt.err (!%p1885_p8)
}
 0x2a4   : > { %s1969_s24 = smov 64   ;;  %s1970_s26 = smov 4  }
 0x2a5   : > { %1627 = dma.vmem_to_hbm [thread:$0]  (%p2493_p1), %s2405_s16, 512, %s2403_s9, %s1250_s21, %s1969_s24, %s1969_s24, %s1970_s26  }
 0x2a6 PF: > { %s2494_s13 = sld [smem:[#allocation19_spill]]  ;;  %s1280_s11 = sand.u32 1, %s1935_s18  }
 0x2a7   : > { %p2496_p13 = scmp.ge.s32.totalorder %s1955_s23, 2  ;;  %s1281_s10 = scalar_lea.sflag [#allocation6], %s1280_s11 }
 0x2ac   : > { %p2495_p2 = scmp.ne.s32.totalorder %s2494_s13, 0 }
 0x2ae   : > { %p1647_p3 = pnand %p2496_p13, %p2495_p2 }
 0x2b0   : > { %1930 = dma.done.wait (!%p1647_p3), %s1281_s10, 512  }
 0x2b1   : > { %1932 = vsyncadd (!%p1647_p3), %s1281_s10, 4294966784  ;;  %s25_s23 = sadd.s32 1, %s1955_s23   ;;  %s2497_s18 = smov %s1939_s19 }
 0x2b2   : > { %p22_p5 = scmp.ge.s32.totalorder %s25_s23, 4   ;;  %s2498_s19 = smov %s1943_s20 }
 0x2b3   : > { %s2499_s20 = smov %s2163_s14  ;;  %s2500_s21 = smov %s1951_s22 }
 0x2b4   : > { %s2501_s22 = smov %s2503_s27  ;;  %24 = sbr.rel (!%p22_p5) target bundleno = 12 (0xc), region = 113 }
 0x2bb   :  { %1286 = vsyncpa [#allocation5], 1 }
 0x2bc   :  { %1288 = vsyncpa [#allocation5 + $0x1], 1 }
 0x2bd   :  { %1289 = vsyncpa [#allocation8], 1 }
 0x2be   :  { %1291 = vsyncpa [#allocation8 + $0x1], 1 }
 0x2bf   :  { %1292 = vsyncpa [#allocation11], 1 }
 0x2c0   :  { %1293 = vsyncpa [#allocation6], 1 }
 0x2c1   :  { %1295 = vsyncpa [#allocation6 + $0x1], 1 }

</bundles_post_ra>
